<compile_context>
chip_gen: v5e
topology: v5e:2x2
jax: 0.10.0
libtpu: 0.0.40
codegen_flags: <defaults>
</compile_context>

<pallas_src>
import jax
import jax.numpy as jnp
import numpy as np
from jax.experimental import pallas as pl
from jax.experimental.pallas import tpu as pltpu


def _round_up(v, m):
    return (v + m - 1) // m * m


def _pad2(w, rows, cols):
    return jnp.pad(w, ((0, rows - w.shape[0]), (0, cols - w.shape[1])))


def _class_attention_kernel(x_ref, wq_ref, wkv_ref, wp_ref, bp_ref,
                            qmask_ref, hscale_ref, kbias_ref, o_ref):
    """One grid step processes a block of `Bt` batch elements.

    x_ref:      (Bt, Np, Cp) f32   padded tokens (cast to bf16 on the VPU in-kernel)
    wq_ref:     (Cp, Cp)     bf16  Wq pre-scaled by head_dim**-0.5
    wkv_ref:    (Cp, 2Cp)    bf16  fused [Wk | Wv]
    wp_ref:     (Cp, Cp)     bf16  output projection
    bp_ref:     (1, Cp)      f32   projection bias
    qmask_ref:  (H, Cp)      f32   1 where channel c belongs to head h else 0
    hscale_ref: (H, Cp)      f32   (1 + lamb[h]) * qmask  (GFSA factor folded in)
    kbias_ref:  (1, Np)      f32   0 for real keys, -1e30 for padded keys
    o_ref:      (Bt, 1, Cp)        one (identical) output row per batch element
    """
    Bt, Np, Cp = x_ref.shape

    # In-kernel cast: read f32 once from HBM, never re-write a bf16 copy.
    x = x_ref[...].astype(jnp.bfloat16)

    # K/V projection for every token; Q projection only for the Bt cls tokens.
    kv = jnp.dot(x.reshape(Bt * Np, Cp), wkv_ref[...],
                 preferred_element_type=jnp.float32)                        # (Bt*Np, 2Cp)
    kb = kv[:, :Cp].astype(jnp.bfloat16).reshape(Bt, Np, Cp)
    vb = kv[:, Cp:].astype(jnp.bfloat16).reshape(Bt, Np, Cp)

    q = jnp.dot(x[:, 0, :], wq_ref[...], preferred_element_type=jnp.float32)  # (Bt, Cp)

    # Per-head scores for all batches/heads at once: zero out cross-head channels of q
    # (heads live in disjoint channel slices) and contract over channels.
    qh = (q[:, None, :] * qmask_ref[...][None, :, :]).astype(jnp.bfloat16)    # (Bt, H, Cp)
    s = jnp.einsum('bhc,bnc->bhn', qh, kb,
                   preferred_element_type=jnp.float32)                        # (Bt, H, Np)
    s = s + kbias_ref[...][None, :, :]                                        # mask padded keys

    # Softmax over keys (lane axis); reciprocal goes to the EUP slot.
    s = s - jnp.max(s, axis=-1, keepdims=True)
    e = jnp.exp(s)
    a = (e * pl.reciprocal(jnp.sum(e, axis=-1, keepdims=True), approx=True)
         ).astype(jnp.bfloat16)                                               # (Bt, H, Np)

    # GFSA: rows of the broadcast (N, N) class-attention matrix are identical and sum
    # to 1, so (attn - I) @ attn == 0 analytically and attn_new == (1 + beta_h) * attn.
    # Head selection and the (1 + lamb_h) factor are folded into hscale; heads collapse
    # with a cheap cross-sublane sum.
    av = jnp.einsum('bhn,bnc->bhc', a, vb, preferred_element_type=jnp.float32)  # (Bt, H, Cp)
    ctx = jnp.sum(av * hscale_ref[...][None, :, :], axis=1)                     # (Bt, Cp)

    # Output projection once per batch element (all N token rows are identical).
    y = jnp.dot(ctx.astype(jnp.bfloat16), wp_ref[...],
                preferred_element_type=jnp.float32) + bp_ref[...]               # (Bt, Cp)

    # TODO(synk): attn_drop / proj_drop are nn.Dropout(0.0) -> identity (eval), omitted.
    o_ref[...] = y[:, None, :].astype(o_ref.dtype)


def _pick_block_b(B, Np, Cp, *, max_block=8, per_step_budget_bytes=24 << 20):
    """Largest divisor of B that fits a rough VMEM budget and keeps the grid >= 2."""
    f32, bf16 = 4, 2
    # per-batch-element resident bytes inside one grid step:
    #   x block (double-buffered, f32) + kv f32 accumulator + k/v bf16 copies
    per_elem = Np * Cp * (2 * f32 + 2 * f32 + 2 * bf16)
    cap = min(max_block, max(1, per_step_budget_bytes // max(per_elem, 1)))
    cap = min(cap, B)
    if B >= 2:
        cap = min(cap, B // 2)   # >= 2 grid steps: megacore sharding + DMA/compute overlap
    bt = max(1, cap)
    while B % bt:
        bt -= 1
    return bt


def _vmem_limit_bytes(block_b, Np, Cp):
    f32, bf16 = 4, 2
    x_blk = 2 * block_b * Np * Cp * f32                  # double-buffered x block
    o_blk = 2 * block_b * Cp * f32                       # double-buffered (Bt,1,Cp) output
    weights = 2 * (4 * Cp * Cp) * bf16                   # wq + wkv + wp, worst-case dbl buf
    temps = block_b * Np * Cp * (2 * f32 + 2 * bf16)     # kv f32 + k/v bf16 copies
    est = x_blk + o_blk + weights + temps
    # Headroom, capped at v7x's 64 MiB physical per-TC VMEM; v5e/v6e (128 MiB physical)
    # can afford larger block_b — re-derive per generation for production shapes.
    return int(min(64 << 20, max(32 << 20, 2 * est)))


def class_attention_forward(x, wq, wk, wv, wp, bp, lamb, *,
                            num_heads=8, horder=4, block_b=None):
    """GFSA Class_Attention forward.  Linear weights are stored as (in, out)."""
    del horder  # The GFSA reaction (h-1)*(attn - I)@attn is analytically zero for the
                # broadcast class attention, so the result does not depend on horder.
    B, N, C = x.shape
    assert C % num_heads == 0
    dh = C // num_heads
    scale = dh ** (-0.5)
    out_dtype = x.dtype

    # Lane/sublane-dense padding: C -> multiple of 128 (lanes), N -> multiple of 8.
    Cp = _round_up(C, 128)
    Np = _round_up(N, 8)

    if block_b is None:
        block_b = _pick_block_b(B, Np, Cp)
    assert B % block_b == 0

    x_p = x if (Np == N and Cp == C) else jnp.pad(x, ((0, 0), (0, Np - N), (0, Cp - C)))

    # bf16 MXU operand weights (f32 accumulation in-kernel); softmax scale folded into Wq.
    wq_p = _pad2(wq * scale, Cp, Cp).astype(jnp.bfloat16)
    wkv_p = jnp.concatenate([_pad2(wk, Cp, Cp), _pad2(wv, Cp, Cp)],
                            axis=1).astype(jnp.bfloat16)                       # (Cp, 2Cp)
    wp_p = _pad2(wp, Cp, Cp).astype(jnp.bfloat16)
    bp_p = _pad2(bp.reshape(1, C), 1, Cp).astype(jnp.float32)

    # Head bookkeeping and the GFSA (1 + lamb) factor folded into tiny (H, Cp) constants.
    chan = jnp.arange(Cp, dtype=jnp.int32)
    head_of_chan = jnp.where(chan < C, chan // dh, -1)
    qmask = (head_of_chan[None, :] ==
             jnp.arange(num_heads, dtype=jnp.int32)[:, None]).astype(jnp.float32)  # (H, Cp)
    hscale = qmask * (1.0 + lamb.astype(jnp.float32))[:, None]                     # (H, Cp)

    # Additive key mask so padded token rows never receive softmax mass.
    kbias = jnp.where(jnp.arange(Np) < N, 0.0, -1e30).astype(jnp.float32).reshape(1, Np)

    # Note: grid-invariant operands (weights / masks) use a constant index_map; Mosaic
    # only re-fetches them once.  pipeline_mode=pl.Buffered(1) could reclaim the second
    # buffer on v7x if VMEM-tight.
    out = pl.pallas_call(
        _class_attention_kernel,
        out_shape=jax.ShapeDtypeStruct((B, 1, Cp), out_dtype),
        grid=(B // block_b,),
        in_specs=[
            pl.BlockSpec((block_b, Np, Cp), lambda i: (i, 0, 0)),   # x block (Bt batches)
            pl.BlockSpec((Cp, Cp), lambda i: (0, 0)),               # Wq (pre-scaled)
            pl.BlockSpec((Cp, 2 * Cp), lambda i: (0, 0)),           # fused Wkv
            pl.BlockSpec((Cp, Cp), lambda i: (0, 0)),               # Wproj
            pl.BlockSpec((1, Cp), lambda i: (0, 0)),                # proj bias
            pl.BlockSpec((num_heads, Cp), lambda i: (0, 0)),        # head mask
            pl.BlockSpec((num_heads, Cp), lambda i: (0, 0)),        # (1 + lamb) head scale
            pl.BlockSpec((1, Np), lambda i: (0, 0)),                # key padding bias
        ],
        out_specs=pl.BlockSpec((block_b, 1, Cp), lambda i: (i, 0, 0)),
        compiler_params=pltpu.CompilerParams(
            dimension_semantics=("parallel",),
            vmem_limit_bytes=_vmem_limit_bytes(block_b, Np, Cp)),
    )(x_p, wq_p, wkv_p, wp_p, bp_p, qmask, hscale, kbias)

    # All N token rows of the module output are identical; broadcast outside the kernel
    # (keeps the kernel's output block / vst traffic at 1/N of the full tensor).
    y_cls = out[:, 0, :C]                                           # (B, C)
    return jnp.broadcast_to(y_cls[:, None, :], (B, N, C))


def class_attention_reference(x, wq, wk, wv, wp, bp, lamb, *, num_heads=8, horder=4):
    """Pure-JAX reference with the full (N, N) GFSA path (same intended semantics)."""
    B, N, C = x.shape
    dh = C // num_heads
    scale = dh ** (-0.5)
    q = (x[:, 0] @ wq).reshape(B, 1, num_heads, dh).transpose(0, 2, 1, 3) * scale
    k = (x @ wk).reshape(B, N, num_heads, dh).transpose(0, 2, 1, 3)
    v = (x @ wv).reshape(B, N, num_heads, dh).transpose(0, 2, 1, 3)
    attn = jax.nn.softmax(q @ jnp.swapaxes(k, -2, -1), axis=-1)      # (B, H, 1, N)
    A = jnp.broadcast_to(attn, (B, num_heads, N, N))
    ident = jnp.eye(N, dtype=x.dtype)[None, None]
    reaction = (horder - 1) * ((A - ident) @ A) + A
    beta = lamb[None, :, None, None]
    A2 = A + beta * reaction
    out = (A2 @ v).transpose(0, 2, 1, 3).reshape(B, N, C)
    return out @ wp + bp[None, None, :]


if __name__ == "__main__":
    B, N, C, H = 2, 8, 32, 8

    key = jax.random.PRNGKey(0)
    kx, kq, kk, kv, kp, kb, kl = jax.random.split(key, 7)

    x = jax.random.normal(kx, (B, N, C), dtype=jnp.float32)
    # Deterministic parameter init (qkv_bias=False -> no q/k/v bias; proj has bias).
    wq = jax.random.normal(kq, (C, C), dtype=jnp.float32) * 0.1
    wk = jax.random.normal(kk, (C, C), dtype=jnp.float32) * 0.1
    wv = jax.random.normal(kv, (C, C), dtype=jnp.float32) * 0.1
    wp = jax.random.normal(kp, (C, C), dtype=jnp.float32) * 0.1
    bp = jax.random.normal(kb, (C,), dtype=jnp.float32) * 0.1
    lamb = jax.random.normal(kl, (H,), dtype=jnp.float32) * 0.1  # module inits to zeros;
    # random here so the GFSA (1 + beta) path is actually exercised.

    y = class_attention_forward(x, wq, wk, wv, wp, bp, lamb, num_heads=H, horder=4)
    y = jax.block_until_ready(y)

    y_ref = class_attention_reference(x, wq, wk, wv, wp, bp, lamb, num_heads=H, horder=4)
    # bf16 MXU operands (f32 accumulation) + approx reciprocal -> bf16-appropriate tolerance.
    np.testing.assert_allclose(np.asarray(y), np.asarray(y_ref), rtol=3e-2, atol=3e-2)

    print("KERNEL_OK")
</pallas_src>

<mosaic_0001>
module attributes {stable_mosaic.version = 11 : i64} {
  func.func @_class_attention_kernel(%arg0: i32, %arg1: memref<1x8x128xf32, #tpu.memory_space<vmem>>, %arg2: memref<128x128xbf16, #tpu.memory_space<vmem>>, %arg3: memref<128x256xbf16, #tpu.memory_space<vmem>>, %arg4: memref<128x128xbf16, #tpu.memory_space<vmem>>, %arg5: memref<1x128xf32, #tpu.memory_space<vmem>>, %arg6: memref<8x128xf32, #tpu.memory_space<vmem>>, %arg7: memref<8x128xf32, #tpu.memory_space<vmem>>, %arg8: memref<1x8xf32, #tpu.memory_space<vmem>>, %arg9: memref<1x1x128xf32, #tpu.memory_space<vmem>>) attributes {dimension_semantics = [#tpu.dimension_semantics<parallel>], iteration_bounds = array<i64: 2>, scalar_prefetch = 0 : i64, scratch_operands = 0 : i64, tpu.core_type = #tpu.core_type<tc>, window_params = [{transform_indices = @transform_0, window_bounds = array<i64: 1, 8, 128>}, {pipeline_mode = #tpu.pipeline_mode<synchronous>, transform_indices = @transform_1, window_bounds = array<i64: 128, 128>}, {pipeline_mode = #tpu.pipeline_mode<synchronous>, transform_indices = @transform_2, window_bounds = array<i64: 128, 256>}, {pipeline_mode = #tpu.pipeline_mode<synchronous>, transform_indices = @transform_3, window_bounds = array<i64: 128, 128>}, {pipeline_mode = #tpu.pipeline_mode<synchronous>, transform_indices = @transform_4, window_bounds = array<i64: 1, 128>}, {pipeline_mode = #tpu.pipeline_mode<synchronous>, transform_indices = @transform_5, window_bounds = array<i64: 8, 128>}, {pipeline_mode = #tpu.pipeline_mode<synchronous>, transform_indices = @transform_6, window_bounds = array<i64: 8, 128>}, {pipeline_mode = #tpu.pipeline_mode<synchronous>, transform_indices = @transform_7, window_bounds = array<i64: 1, 8>}, {transform_indices = @transform_8, window_bounds = array<i64: 1, 1, 128>}]} {
    %c0 = arith.constant 0 : index
    %c0_0 = arith.constant 0 : index
    %c0_1 = arith.constant 0 : index
    %0 = vector.load %arg1[%c0, %c0_0, %c0_1] : memref<1x8x128xf32, #tpu.memory_space<vmem>>, vector<1x8x128xf32>
    %1 = arith.truncf %0 : vector<1x8x128xf32> to vector<1x8x128xbf16>
    %2 = vector.shape_cast %1 : vector<1x8x128xbf16> to vector<8x128xbf16>
    %c0_2 = arith.constant 0 : index
    %c0_3 = arith.constant 0 : index
    %3 = vector.load %arg3[%c0_2, %c0_3] : memref<128x256xbf16, #tpu.memory_space<vmem>>, vector<128x256xbf16>
    %cst = arith.constant dense<0.000000e+00> : vector<8x256xf32>
    %4 = tpu.matmul %2, %3, %cst {dimension_numbers = #tpu.dot_dimension_numbers<[1], [0], [0], [1], [0, 0, 1, 1], [], []>} : vector<8x128xbf16>, vector<128x256xbf16>, vector<8x256xf32> -> vector<8x256xf32>
    %5 = vector.extract_strided_slice %4 {offsets = [0, 0], sizes = [8, 128], strides = [1, 1]} : vector<8x256xf32> to vector<8x128xf32>
    %6 = arith.truncf %5 : vector<8x128xf32> to vector<8x128xbf16>
    %7 = vector.shape_cast %6 : vector<8x128xbf16> to vector<1x8x128xbf16>
    %8 = vector.extract_strided_slice %4 {offsets = [0, 128], sizes = [8, 128], strides = [1, 1]} : vector<8x256xf32> to vector<8x128xf32>
    %9 = arith.truncf %8 : vector<8x128xf32> to vector<8x128xbf16>
    %10 = vector.shape_cast %9 : vector<8x128xbf16> to vector<1x8x128xbf16>
    %11 = vector.extract_strided_slice %1 {offsets = [0, 0, 0], sizes = [1, 1, 128], strides = [1, 1, 1]} : vector<1x8x128xbf16> to vector<1x1x128xbf16>
    %12 = vector.shape_cast %11 : vector<1x1x128xbf16> to vector<1x128xbf16>
    %c0_4 = arith.constant 0 : index
    %c0_5 = arith.constant 0 : index
    %13 = vector.load %arg2[%c0_4, %c0_5] : memref<128x128xbf16, #tpu.memory_space<vmem>>, vector<128x128xbf16>
    %cst_6 = arith.constant dense<0.000000e+00> : vector<1x128xf32>
    %14 = tpu.matmul %12, %13, %cst_6 {dimension_numbers = #tpu.dot_dimension_numbers<[1], [0], [0], [1], [0, 0, 1, 1], [], []>} : vector<1x128xbf16>, vector<128x128xbf16>, vector<1x128xf32> -> vector<1x128xf32>
    %15 = vector.shape_cast %14 : vector<1x128xf32> to vector<1x1x128xf32>
    %c0_7 = arith.constant 0 : index
    %c0_8 = arith.constant 0 : index
    %16 = vector.load %arg6[%c0_7, %c0_8] : memref<8x128xf32, #tpu.memory_space<vmem>>, vector<8x128xf32>
    %17 = vector.shape_cast %16 : vector<8x128xf32> to vector<1x8x128xf32>
    %18 = vector.broadcast %15 : vector<1x1x128xf32> to vector<1x8x128xf32>
    %19 = arith.mulf %18, %17 : vector<1x8x128xf32>
    %20 = arith.truncf %19 : vector<1x8x128xf32> to vector<1x8x128xbf16>
    "tpu.trace_start"() <{level = 10 : i32, message = "bhc,bnc->bhn"}> : () -> ()
    %cst_9 = arith.constant dense<0.000000e+00> : vector<1x8x8xf32>
    %21 = tpu.matmul %20, %7, %cst_9 {dimension_numbers = #tpu.dot_dimension_numbers<[2], [2], [1], [1], [0, 0, 0, 1, 1, 1], [0], [0]>} : vector<1x8x128xbf16>, vector<1x8x128xbf16>, vector<1x8x8xf32> -> vector<1x8x8xf32>
    "tpu.trace_stop"() : () -> ()
    %c0_10 = arith.constant 0 : index
    %c0_11 = arith.constant 0 : index
    %22 = vector.load %arg8[%c0_10, %c0_11] : memref<1x8xf32, #tpu.memory_space<vmem>>, vector<1x8xf32>
    %23 = vector.shape_cast %22 : vector<1x8xf32> to vector<1x1x8xf32>
    %24 = vector.broadcast %23 : vector<1x1x8xf32> to vector<1x8x8xf32>
    %25 = arith.addf %21, %24 : vector<1x8x8xf32>
    %cst_12 = arith.constant dense<0xFF800000> : vector<1x8xf32>
    %26 = vector.multi_reduction <maximumf>, %25, %cst_12 [2] : vector<1x8x8xf32> to vector<1x8xf32>
    %27 = vector.shape_cast %26 : vector<1x8xf32> to vector<1x8x1xf32>
    %28 = vector.broadcast %27 : vector<1x8x1xf32> to vector<1x8x8xf32>
    %29 = arith.subf %25, %28 : vector<1x8x8xf32>
    %30 = math.exp %29 : vector<1x8x8xf32>
    %cst_13 = arith.constant dense<0.000000e+00> : vector<1x8xf32>
    %31 = vector.multi_reduction <add>, %30, %cst_13 [2] : vector<1x8x8xf32> to vector<1x8xf32>
    %32 = vector.shape_cast %31 : vector<1x8xf32> to vector<1x8x1xf32>
    %33 = tpu.reciprocal %32 {approx = true} : vector<1x8x1xf32> -> vector<1x8x1xf32>
    %34 = vector.broadcast %33 : vector<1x8x1xf32> to vector<1x8x8xf32>
    %35 = arith.mulf %30, %34 : vector<1x8x8xf32>
    %36 = arith.truncf %35 : vector<1x8x8xf32> to vector<1x8x8xbf16>
    "tpu.trace_start"() <{level = 10 : i32, message = "bhn,bnc->bhc"}> : () -> ()
    %cst_14 = arith.constant dense<0.000000e+00> : vector<1x8x128xf32>
    %37 = tpu.matmul %36, %10, %cst_14 {dimension_numbers = #tpu.dot_dimension_numbers<[2], [1], [1], [2], [0, 0, 0, 1, 1, 2], [0], [0]>} : vector<1x8x8xbf16>, vector<1x8x128xbf16>, vector<1x8x128xf32> -> vector<1x8x128xf32>
    "tpu.trace_stop"() : () -> ()
    %c0_15 = arith.constant 0 : index
    %c0_16 = arith.constant 0 : index
    %38 = vector.load %arg7[%c0_15, %c0_16] : memref<8x128xf32, #tpu.memory_space<vmem>>, vector<8x128xf32>
    %39 = vector.shape_cast %38 : vector<8x128xf32> to vector<1x8x128xf32>
    %40 = arith.mulf %37, %39 : vector<1x8x128xf32>
    %cst_17 = arith.constant dense<0.000000e+00> : vector<1x128xf32>
    %41 = vector.multi_reduction <add>, %40, %cst_17 [1] : vector<1x8x128xf32> to vector<1x128xf32>
    %42 = arith.truncf %41 : vector<1x128xf32> to vector<1x128xbf16>
    %c0_18 = arith.constant 0 : index
    %c0_19 = arith.constant 0 : index
    %43 = vector.load %arg4[%c0_18, %c0_19] : memref<128x128xbf16, #tpu.memory_space<vmem>>, vector<128x128xbf16>
    %cst_20 = arith.constant dense<0.000000e+00> : vector<1x128xf32>
    %44 = tpu.matmul %42, %43, %cst_20 {dimension_numbers = #tpu.dot_dimension_numbers<[1], [0], [0], [1], [0, 0, 1, 1], [], []>} : vector<1x128xbf16>, vector<128x128xbf16>, vector<1x128xf32> -> vector<1x128xf32>
    %c0_21 = arith.constant 0 : index
    %c0_22 = arith.constant 0 : index
    %45 = vector.load %arg5[%c0_21, %c0_22] : memref<1x128xf32, #tpu.memory_space<vmem>>, vector<1x128xf32>
    %46 = arith.addf %44, %45 : vector<1x128xf32>
    %47 = vector.shape_cast %46 : vector<1x128xf32> to vector<1x1x128xf32>
    %c0_23 = arith.constant 0 : index
    %c0_24 = arith.constant 0 : index
    %c0_25 = arith.constant 0 : index
    %48 = vector.load %arg9[%c0_23, %c0_24, %c0_25] : memref<1x1x128xf32, #tpu.memory_space<vmem>>, vector<1x1x128xf32>
    tpu.vector_store %arg9[%c0_23, %c0_24, %c0_25], %47 {strides = array<i32>} : memref<1x1x128xf32, #tpu.memory_space<vmem>>, vector<1x1x128xf32>,
    return
  }
  func.func @transform_0(%arg0: i32) -> (i32, i32, i32) {
    %c0_i32 = arith.constant 0 : i32
    %c0_i32_0 = arith.constant 0 : i32
    %c0_i32_1 = arith.constant 0 : i32
    return %arg0, %c0_i32, %c0_i32_0 : i32, i32, i32
  }
  func.func @transform_1(%arg0: i32) -> (i32, i32) {
    %c0_i32 = arith.constant 0 : i32
    %c0_i32_0 = arith.constant 0 : i32
    %c0_i32_1 = arith.constant 0 : i32
    return %c0_i32, %c0_i32_0 : i32, i32
  }
  func.func @transform_2(%arg0: i32) -> (i32, i32) {
    %c0_i32 = arith.constant 0 : i32
    %c0_i32_0 = arith.constant 0 : i32
    %c0_i32_1 = arith.constant 0 : i32
    return %c0_i32, %c0_i32_0 : i32, i32
  }
  func.func @transform_3(%arg0: i32) -> (i32, i32) {
    %c0_i32 = arith.constant 0 : i32
    %c0_i32_0 = arith.constant 0 : i32
    %c0_i32_1 = arith.constant 0 : i32
    return %c0_i32, %c0_i32_0 : i32, i32
  }
  func.func @transform_4(%arg0: i32) -> (i32, i32) {
    %c0_i32 = arith.constant 0 : i32
    %c0_i32_0 = arith.constant 0 : i32
    %c0_i32_1 = arith.constant 0 : i32
    return %c0_i32, %c0_i32_0 : i32, i32
  }
  func.func @transform_5(%arg0: i32) -> (i32, i32) {
    %c0_i32 = arith.constant 0 : i32
    %c0_i32_0 = arith.constant 0 : i32
    %c0_i32_1 = arith.constant 0 : i32
    return %c0_i32, %c0_i32_0 : i32, i32
  }
  func.func @transform_6(%arg0: i32) -> (i32, i32) {
    %c0_i32 = arith.constant 0 : i32
    %c0_i32_0 = arith.constant 0 : i32
    %c0_i32_1 = arith.constant 0 : i32
    return %c0_i32, %c0_i32_0 : i32, i32
  }
  func.func @transform_7(%arg0: i32) -> (i32, i32) {
    %c0_i32 = arith.constant 0 : i32
    %c0_i32_0 = arith.constant 0 : i32
    %c0_i32_1 = arith.constant 0 : i32
    return %c0_i32, %c0_i32_0 : i32, i32
  }
  func.func @transform_8(%arg0: i32) -> (i32, i32, i32) {
    %c0_i32 = arith.constant 0 : i32
    %c0_i32_0 = arith.constant 0 : i32
    %c0_i32_1 = arith.constant 0 : i32
    return %arg0, %c0_i32, %c0_i32_0 : i32, i32, i32
  }
}

</mosaic_0001>

<bundles_post_ra>
// kernel: tpu_custom_call.1
= control target key start
LH: loop header
LB: loop body
LE: loop exit
PB: predicated region body
PF: predicated region fallthrough
CT: control target
= control target key end

     0   :  { %s1657_s0 = inlined_call_operand.hbm [shape: f32[2,8,128], index: 0, kind: input, shape index: {}]   ;;  %s1658_s1 = inlined_call_operand.hbm [shape: bf16[128,128], index: 1, kind: input, shape index: {}]   ;;  %s1659_s2 = inlined_call_operand.hbm [shape: bf16[128,256], index: 2, kind: input, shape index: {}]   ;;  %s1660_s3 = inlined_call_operand.hbm [shape: bf16[128,128], index: 3, kind: input, shape index: {}]   ;;  %s1661_s4 = inlined_call_operand.vmem [shape: f32[1,128], index: 4, kind: input, shape index: {}]   ;;  %s1662_s5 = inlined_call_operand.hbm [shape: f32[8,128], index: 5, kind: input, shape index: {}]   ;;  %s1663_s6 = inlined_call_operand.hbm [shape: f32[8,128], index: 6, kind: input, shape index: {}]   ;;  %s1664_s7 = inlined_call_operand.vmem [shape: f32[1,8], index: 7, kind: input, shape index: {}]   ;;  %s1665_s8 = inlined_call_operand.hbm [shape: f32[2,1,128], index: 8, kind: output, shape index: {}]  }
   0x1   :  { %1666 = sst [smem:[#allocation19_spill]] %s1658_s1 }
   0x2   :  { %1667 = sst [smem:[#allocation20_spill]] %s1659_s2 }
   0x3   :  { %13 = vsyncpa [#allocation3], 0 }
   0x4   :  { %15 = vsyncpa [#allocation3 + $0x1], 0 }
   0x5   :  { %16 = vsyncpa [#allocation6], 0 }
   0x6   :  { %17 = vsyncpa [#allocation9], 0 }
   0x7   :  { %18 = vsyncpa [#allocation12], 0 }
   0x8   :  { %19 = vsyncpa [#allocation4], 0 }
   0x9   :  { %21 = vsyncpa [#allocation4 + $0x1], 0  ;;  %s1474_s27 = smov 0   ;;  %s1476_s28 = smov 0  }
   0xa   :  { %s1478_s29 = smov 0   ;;  %s1480_s30 = smov 0  }
   0xb LB: > { %s1668_s1 = sld [smem:[#allocation19_spill]]  ;;  %s1498_s12 = sadd.s32 4294967295, %s1418_s30   ;;  %s1418_s30 = sphi %s1480_s30, %s1680_s30   ;;  %s1414_s29 = sphi %s1478_s29, %s1679_s29   ;;  %s1410_s28 = sphi %s1476_s28, %s1678_s28   ;;  %s1406_s27 = sphi %s1474_s27, %s1677_s27  }
   0xc   : > { %p875_p0 = scmp.ge.s32.totalorder %s1418_s30, 1  ;;  %p48_p1 = scmp.eq.s32.totalorder %s1498_s12, 0 }
   0xd   : > { %p231_p2 = scmp.lt.s32.totalorder %s1418_s30, 3  ;;  %s1420_s14 = smov [#allocation5]  }
   0xe   : > { %s244_s15 = sshll.u32 %s1420_s14, 4  ;;  %s270_s18 = sshll.u32 %s1660_s3, 4  ;;  %s245_s15 = int_to_ptr.vmem [resolvable:$true] %s244_s15  ;;  %s271_s18 = int_to_ptr.hbm [resolvable:$true] %s270_s18 }
   0xf   : > { %p1503_p3 = pnand %p875_p0, %p231_p2  ;;  %s1671_s2 = sld [smem:[#allocation20_spill]] }
  0x10   : > { %s1421_s23 = smov [#allocation8]   ;;  %s1422_s25 = smov 64  }
  0x11   : > { %s242_s11 = sshll.u32 %s1668_s1, 4  ;;  %p1078_p4 = pneg %p1503_p3  ;;  %s243_s11 = int_to_ptr.hbm [resolvable:$true] %s242_s11 }
  0x12   : > { %s272_s24 = sshll.u32 %s1421_s23, 4  ;;  %s1423_s26 = smov 4   ;;  %s273_s24 = int_to_ptr.vmem [resolvable:$true] %s272_s24 }
  0x13   : > { %p1515_p6 = pnand %p1078_p4, %p48_p1  ;;  %s1424_s9 = smov [#allocation7]  }
  0x14   : > { %s258_s10 = sshll.u32 %s1424_s9, 4  ;;  %s288_s17 = sshll.u32 %s1662_s5, 4  ;;  %s259_s10 = int_to_ptr.vmem [resolvable:$true] %s258_s10  ;;  %s289_s17 = int_to_ptr.hbm [resolvable:$true] %s288_s17 }
  0x15   : > { %s256_s22 = sshll.u32 %s1671_s2, 4  ;;  %s1425_s20 = smov 128   ;;  %s257_s22 = int_to_ptr.hbm [resolvable:$true] %s256_s22 }
  0x16   : > { %1081 = dma.hbm_to_vmem [thread:$0]  (!%p1515_p6), %s243_s11, 1024, %s245_s15, [#allocation6], %s1422_s25, %s1422_s25, %s1423_s26  }
  0x17   : > { %1087 = dma.hbm_to_vmem [thread:$0]  (!%p1515_p6), %s271_s18, 1024, %s273_s24, [#allocation9], %s1422_s25, %s1422_s25, %s1423_s26  }
  0x18   : > { %s1426_s21 = smov 8   ;;  %s1427_s11 = smov [#allocation10]  }
  0x19   : > { %1084 = dma.hbm_to_vmem [thread:$0]  (!%p1515_p6), %s257_s22, 2048, %s259_s10, [#allocation6], %s1425_s20, %s1425_s20, %s1426_s21  }
  0x1a   : > { %s290_s15 = sshll.u32 %s1427_s11, 4  ;;  %s300_s24 = sshll.u32 %s1663_s6, 4  ;;  %s291_s15 = int_to_ptr.vmem [resolvable:$true] %s290_s15  ;;  %s301_s24 = int_to_ptr.hbm [resolvable:$true] %s300_s24 }
  0x1b   : > { %1090 = dma.hbm_to_vmem [thread:$0]  (!%p1515_p6), %s289_s17, 128, %s291_s15, [#allocation9]  }
  0x1c   : > { %s1428_s22 = smov [#allocation11]   ;;  %s874_s26 = sadd.s32 4294967294, %s1418_s30  }
  0x1d   : > { %s302_s25 = sshll.u32 %s1428_s22, 4  ;;  %s1540_s9 = sadd.s32 1, %s1418_s30   ;;  %s303_s25 = int_to_ptr.vmem [resolvable:$true] %s302_s25 }
  0x1e   : > { %1093 = dma.hbm_to_vmem [thread:$0]  (!%p1515_p6), %s301_s24, 128, %s303_s25, [#allocation12]  }
  0x1f   : > { %s34_s10 = sadd.s32 1, %s1414_s29  ;;  %s31_s14 = ssub.s32 %s1418_s30, %s1540_s9 }
  0x20   : > { %p41_p7 = scmp.ne.s32.totalorder %s1414_s29, %s1410_s28  ;;  %p32_p8 = scmp.eq.s32.totalorder %s31_s14, 0 }
  0x21   : > { %p42_p9 = scmp.eq.s32.totalorder %s1418_s30, 0  ;;  %p47_p10 = scmp.ne.s32.totalorder %s1410_s28, %s1406_s27 }
  0x22   : > { %p218_p11 = scmp.eq.s32.totalorder %s1498_s12, 1  ;;  %p224_p0 = scmp.eq.s32.totalorder %s874_s26, 1 }
  0x23   : > { %s1552_s16 = scalar_select %p32_p8, %s1414_s29, %s34_s10  }
  0x24   : > { %p1556_p12 = por %p48_p1, %p47_p10  ;;  %p1560_p13 = por %p218_p11, %p41_p7 }
  0x25   : > { %p43_p2 = por %p42_p9, %p41_p7  ;;  %s316_s20 = sand.u32 1, %s1414_s29  }
  0x26   : > { %p1565_p4 = por %p224_p0, %p47_p10  ;;  %p1107_p6 = scmp.lt.s32.totalorder %s1418_s30, 2 }
  0x27   : > { %s882_s11 = sshll.u32 %s316_s20, 3  ;;  %s883_s15 = sshll.u32 %s1418_s30, 3 }
  0x28   : > { %s324_s24 = scalar_lea.hbm %s1657_s0, %s883_s15  ;;  %s320_s25 = scalar_lea.vmem [#allocation2], %s882_s11 }
  0x29   : > { %s326_s22 = sshll.u32 %s324_s24, 4  ;;  %s328_s10 = sshll.u32 %s320_s25, 4  ;;  %s327_s22 = int_to_ptr.hbm [resolvable:$true] %s326_s22  ;;  %s329_s10 = int_to_ptr.vmem [resolvable:$true] %s328_s10 }
  0x2a   : > { %p1574_p8 = pnand %p1107_p6, %p43_p2  ;;  %s317_s14 = scalar_lea.sflag [#allocation3], %s316_s20 }
  0x2b   : > { %s1310_s1 = sshra.s32 %s327_s22, 4  ;;  %s1317_s11 = scalar_lea.hbm %s1657_s0, 16  ;;  %s1311_s1 = int_to_ptr.hbm [resolvable:$true] %s1310_s1 }
  0x2c   : > { %s1312_s2 = scalar_lea.hbm %s1311_s1, 8  ;;  %p1314_p9 = pneg %p1574_p8 }
  0x2d   : > { %p1313_p7 = scmp.ne.s32.totalorder %s1311_s1, %s1312_s2  ;;  %p1318_p0 = scmp.lt.s32.totalorder %s1311_s1, %s1657_s0 }
  0x2e   : > { %p1319_p2 = scmp.lt.s32.totalorder %s1317_s11, %s1312_s2 }
  0x2f   : > { %p1315_p10 = pnand %p1314_p9, %p1313_p7 }
  0x30   : > { %p1320_p6 = por %p1319_p2, %p1318_p0 }
  0x31   : > { %p1316_p11 = pneg %p1315_p10 }
  0x33   : > { %p1321_p5 = pnand %p1320_p6, %p1316_p11 }
  0x35   : > { %1324 = shalt.err (!%p1321_p5)
}
  0x36   : > { %1097 = dma.hbm_to_vmem [thread:$0]  (!%p1574_p8), %s327_s22, 128, %s329_s10, %s317_s14  }
  0x37   : > { %337 = sbr.rel (%p1503_p3) target bundleno = 910 (0x38e), region = 52  ;;  %s1591_s20 = sand.u32 (!%p1503_p3), 1, %s1410_s28  }
  0x38   : > { %s885_s25 = sshll.u32 (!%p1503_p3), %s1591_s20, 3  ;;  %s340_s15 = scalar_lea.sflag (!%p1503_p3), [#allocation3], %s1591_s20 }
  0x39   : > { %s1595_s18 = scalar_lea.vmem (!%p1503_p3), [#allocation2], %s885_s25 }
  0x3c   : > { %1385 = dma.done.wait (%p1556_p12), %s340_s15, 128  }
  0x3d   : > { %1387 = vsyncadd (%p1556_p12), %s340_s15, 4294967168 }
  0x3e   : > { %1389 = dma.done.wait (%p48_p1), [#allocation6], 3072  }
  0x3f   : > { %1391 = vsyncadd (%p48_p1), [#allocation6], 4294964224 }
  0x40   : > { %1393 = dma.done.wait (%p48_p1), [#allocation9], 1152  }
  0x41   : > { %1395 = vsyncadd (%p48_p1), [#allocation9], 4294966144 }
  0x42   : > { %1397 = dma.done.wait (%p48_p1), [#allocation12], 128  }
  0x43   : > { %1399 = vsyncadd (%p48_p1), [#allocation12], 4294967168  ;;  %v949_v0 = vld [vmem:[#allocation7 + $0x70] sm:$0xf]  ;;  %v1037_v1 = vld [vmem:[#allocation7 + $0x74] sm:$0xf0]  ;;  %s756_s22 = scalar_lea.hbm %s1665_s8, %s1498_s12 }
  0x44   : > { %v1045_v2 = vld [vmem:[#allocation5 + $0x38] sm:$0xff]  ;;  %v950_v3 = vor.u32 %v1037_v1, %v949_v0  ;;  %v941_v4 = vld [vmem:[#allocation7 + $0x60] sm:$0xf]  ;;  %v1035_v5 = vld [vmem:[#allocation7 + $0x64] sm:$0xf0]  ;;  %vm626_vm0 = vcmask 64512  }
  0x45   : > { %592 = vmatpush.bf16.msra.mxu2 %v1045_v2  ;;  %v1044_v6 = vld [vmem:[#allocation5 + $0x30] sm:$0xff]  ;;  %v942_v7 = vor.u32 %v1035_v5, %v941_v4  ;;  %v1033_v9 = vld [vmem:[#allocation7 + $0x54] sm:$0xf0]  ;;  %v1043_v10 = vld [vmem:[#allocation5 + $0x28] sm:$0xff]  ;;  %vm642_vm1 = vcmask 1043456   ;;  %s400_s14 = scalar_lea.vmem [#allocation13], %s1591_s20 }
  0x46   : > { %500 = vmatpush.bf16.msra.mxu0 %v950_v3  ;;  %v933_v8 = vld [vmem:[#allocation7 + $0x50] sm:$0xf]  ;;  %v925_v12 = vld [vmem:[#allocation7 + $0x40] sm:$0xf]  ;;  %v1031_v13 = vld [vmem:[#allocation7 + $0x44] sm:$0xf0] }
  0x47   : > { %v934_v11 = vor.u32 %v1033_v9, %v933_v8  ;;  %v1042_v14 = vld [vmem:[#allocation5 + $0x20] sm:$0xff]  ;;  %v926_v15 = vor.u32 %v1031_v13, %v925_v12  ;;  %v917_v16 = vld [vmem:[#allocation7 + $0x30] sm:$0xf]  ;;  %v1029_v17 = vld [vmem:[#allocation7 + $0x34] sm:$0xf0]  ;;  %s758_s11 = sshll.u32 %s400_s14, 4  ;;  %s759_s11 = int_to_ptr.vmem [resolvable:$true] %s758_s11 }
  0x48   : > { %v1041_v18 = vld [vmem:[#allocation5 + $0x18] sm:$0xff]  ;;  %v918_v19 = vor.u32 %v1029_v17, %v917_v16  ;;  %v909_v20 = vld [vmem:[#allocation7 + $0x20] sm:$0xf]  ;;  %v1027_v21 = vld [vmem:[#allocation7 + $0x24] sm:$0xf0]  ;;  %s760_s23 = sshll.u32 %s756_s22, 4  ;;  %s761_s23 = int_to_ptr.hbm [resolvable:$true] %s760_s23 }
  0x49   : > { %593 = vmatpush.bf16.msra.mxu2 %v1044_v6  ;;  %v1040_v22 = vld [vmem:[#allocation5 + $0x10] sm:$0xff]  ;;  %v910_v23 = vor.u32 %v1027_v21, %v909_v20  ;;  %v1025_v25 = vld [vmem:[#allocation7 + $0x14] sm:$0xf0]  ;;  %v1039_v26 = vld [vmem:[#allocation5 + $0x8] sm:$0xff]  ;;  %s748_s24 = scalar_lea.sflag [#allocation4], %s1591_s20  ;;  %s1354_s25 = sshra.s32 %s761_s23, 4  ;;  %s1355_s25 = int_to_ptr.hbm [resolvable:$true] %s1354_s25 }
  0x4a   : > { %501 = vmatpush.bf16.msra.mxu0 %v942_v7  ;;  %v901_v24 = vld [vmem:[#allocation7 + $0x10] sm:$0xf]  ;;  %v893_v28 = vld [vmem:[#allocation7] sm:$0xf]  ;;  %v1023_v29 = vld [vmem:[#allocation7 + $0x4] sm:$0xf0]  ;;  %p1361_p12 = scmp.lt.s32.totalorder %s1355_s25, %s1665_s8 }
  0x4b   : > { %v902_v27 = vor.u32 %v1025_v25, %v901_v24  ;;  %v1038_v30 = vld [vmem:[#allocation5] sm:$0xff]  ;;  %v402_v31 = vld [vmem:[%s1595_s18] sm:$0xff]  ;;  %v894_v32 = vor.u32 %v1023_v29, %v893_v28  ;;  %v943_v47 = vld [vmem:[#allocation7 + $0x68] sm:$0xf0]  ;;  %s1356_s15 = scalar_lea.hbm %s1355_s25, 1  ;;  %s1360_s1 = scalar_lea.hbm %s1665_s8, 2 }
  0x4c   : > { %v403_v33 = vpack.c.bf16 %v402_v31, %v402_v31  ;;  %v605_v37 = vld [vmem:[#allocation10] sm:$0xff]  ;;  %v1036_v43 = vld [vmem:[#allocation7 + $0x74] sm:$0xf]  ;;  %v951_v44 = vld [vmem:[#allocation7 + $0x78] sm:$0xf0]  ;;  %p1357_p1 = scmp.ne.s32.totalorder %s1355_s25, %s1356_s15  ;;  %p1362_p8 = scmp.lt.s32.totalorder %s1360_s1, %s1356_s15 }
  0x4d   : > { %594 = vmatpush.bf16.msra.mxu2 %v1043_v10  ;;  %v1034_v45 = vld [vmem:[#allocation7 + $0x64] sm:$0xf]  ;;  %v954_v46 = vor.u32 %v1036_v43, %v951_v44  ;;  %v1032_v49 = vld [vmem:[#allocation7 + $0x54] sm:$0xf]  ;;  %v935_v50 = vld [vmem:[#allocation7 + $0x58] sm:$0xf0] }
  0x4e   : > { %502 = vmatpush.bf16.msra.mxu0 %v934_v11  ;;  %v946_v48 = vor.u32 %v1034_v45, %v943_v47  ;;  %v938_v51 = vor.u32 %v1032_v49, %v935_v50  ;;  %v1030_v52 = vld [vmem:[#allocation7 + $0x44] sm:$0xf]  ;;  %v927_v53 = vld [vmem:[#allocation7 + $0x48] sm:$0xf0]  ;;  %v1028_v55 = vld [vmem:[#allocation7 + $0x34] sm:$0xf]  ;;  %p1358_p3 = pnand %p1357_p1, %p1560_p13  ;;  %p1363_p7 = por %p1362_p8, %p1361_p12 }
  0x4f   : > { %513 = vmatpush.bf16.msra.mxu1 %v954_v46  ;;  %v930_v54 = vor.u32 %v1030_v52, %v927_v53  ;;  %v919_v56 = vld [vmem:[#allocation7 + $0x38] sm:$0xf0]  ;;  %v1026_v58 = vld [vmem:[#allocation7 + $0x24] sm:$0xf]  ;;  %v911_v59 = vld [vmem:[#allocation7 + $0x28] sm:$0xf0] }
  0x50   : > { %v922_v57 = vor.u32 %v1028_v55, %v919_v56  ;;  %v914_v60 = vor.u32 %v1026_v58, %v911_v59  ;;  %v1024_v61 = vld [vmem:[#allocation7 + $0x14] sm:$0xf]  ;;  %v903_v62 = vld [vmem:[#allocation7 + $0x18] sm:$0xf0]  ;;  %v1155_v63 = vld [vmem:[%s1664_s7] ss:$0 sm:$0xff]  ;;  %p1359_p5 = pneg %p1358_p3 }
  0x51   : > { %595 = vmatpush.bf16.msra.mxu2 %v1042_v14  ;;  %v906_v0 = vor.u32 %v1024_v61, %v903_v62  ;;  %v1022_v5 = vld [vmem:[#allocation7 + $0x4] sm:$0xf]  ;;  %v895_v6 = vld [vmem:[#allocation7 + $0x8] sm:$0xf0]  ;;  %v1053_v17 = vld [vmem:[#allocation8 + $0x38] sm:$0xff] }
  0x52   : > { %503 = vmatpush.bf16.msra.mxu0 %v926_v15  ;;  %v898_v7 = vor.u32 %v1022_v5, %v895_v6  ;;  %v1050_v20 = vld [vmem:[#allocation8 + $0x20] sm:$0xff]  ;;  %v1049_v25 = vld [vmem:[#allocation8 + $0x18] sm:$0xff]  ;;  %v659_v29 = vld [vmem:[#allocation11] sm:$0xff]  ;;  %p1364_p9 = pnand %p1363_p7, %p1359_p5 }
  0x53   : > { %514 = vmatpush.bf16.msra.mxu1 %v946_v48  ;;  %v1046_v28 = vld [vmem:[#allocation8] sm:$0xff] }
  0x55   : > { %596 = vmatpush.bf16.msra.mxu2 %v1041_v18  ;;  %v1052_v18 = vld [vmem:[#allocation8 + $0x30] sm:$0xff] }
  0x56   : > { %504 = vmatpush.bf16.msra.mxu0 %v918_v19  ;;  %v1051_v19 = vld [vmem:[#allocation8 + $0x28] sm:$0xff] }
  0x57   : > { %515 = vmatpush.bf16.msra.mxu1 %v938_v51 }
  0x59   : > { %597 = vmatpush.bf16.msra.mxu2 %v1040_v22 }
  0x5a   : > { %505 = vmatpush.bf16.msra.mxu0 %v910_v23 }
  0x5b   : > { %516 = vmatpush.bf16.msra.mxu1 %v930_v54 }
  0x5d   : > { %598 = vmatpush.bf16.msra.mxu2 %v1039_v26  ;;  %v1048_v26 = vld [vmem:[#allocation8 + $0x10] sm:$0xff] }
  0x5e   : > { %506 = vmatpush.bf16.msra.mxu0 %v902_v27  ;;  %v1047_v27 = vld [vmem:[#allocation8 + $0x8] sm:$0xff] }
  0x5f   : > { %517 = vmatpush.bf16.msra.mxu1 %v922_v57 }
  0x61   : > { %599 = vmatpush.bf16.msra.mxu2 %v1038_v30 }
  0x62   : > { %507 = vmatpush.bf16.msra.mxu0 %v894_v32 }
  0x63   : > { %518 = vmatpush.bf16.msra.mxu1 %v914_v60 }
  0x64   : > { %600 = vmatmul.bf16.vlgmr.msra.gmra.mxu2 %v403_v33 }
  0x65   : > { %508 = vmatmul.bf16.vlgmr.msra.gmra.mxu0 %v403_v33 }
  0x67   : > { %519 = vmatpush.bf16.msra.mxu1 %v906_v0 }
  0x6b   : > { %520 = vmatpush.bf16.msra.mxu1 %v898_v7 }
  0x6e   : > { %521 = vmatmul.bf16.vlgmr.msra.gmra.mxu1 %v403_v33 }
  0xe2   : > { %v509_v34 = vpop.f32.mrf.mxu0 }
  0xe3   : > { %v526_v35 = vpack.c.bf16 %v509_v34, %v509_v34 }
  0xe5   : > { %620 = vmatpush.bf16.xpose.msrb.mxu0 %v526_v35 }
  0xe7   : > { %v601_v36 = vpop.f32.mrf.mxu2 }
  0xe8   : > { %v606_v38 = vperm.slane %v601_v36, 0 }
  0xea   : > { %v607_v39 = vmul.f32 %v606_v38, %v605_v37  ;;  %v511_v40 = vpop.f32.mrf.mxu0 }
  0xeb   : > { %v522_v13 = vpop.f32.mrf.mxu1  ;;  %v684_v40 = vld [vmem:[%s1661_s4] sm:$0x1] }
  0xec   : > { %v608_v41 = vpack.c.bf16 %v607_v39, %v607_v39  ;;  %v527_v14 = vpack.c.bf16 %v522_v13, %v522_v13 }
  0xee   : > { %621 = vmatmul.bf16.vlgmr.msrb.gmra.mxu0 %v608_v41  ;;  %v644_v15 = vsel %vm642_vm1, %v527_v14, 0 }
  0xef   : > { %v603_v42 = vpop.f32.mrf.mxu2  ;;  %653 = vmatpush.bf16.msra.mxu3 %v644_v15 }
  0xf3   : > { %v524_v16 = vpop.f32.mrf.mxu1  ;;  %733 = vmatpush.bf16.msrb.mxu3 %v1053_v17 }
  0xf7   : > { %734 = vmatpush.bf16.msrb.mxu3 %v1052_v18 }
  0xfb   : > { %735 = vmatpush.bf16.msrb.mxu3 %v1051_v19 }
  0xff   : > { %736 = vmatpush.bf16.msrb.mxu3 %v1050_v20 }
 0x103   : > { %737 = vmatpush.bf16.msrb.mxu3 %v1049_v25 }
 0x107   : > { %738 = vmatpush.bf16.msrb.mxu3 %v1048_v26 }
 0x10b   : > { %739 = vmatpush.bf16.msrb.mxu3 %v1047_v27 }
 0x10f   : > { %740 = vmatpush.bf16.msrb.mxu3 %v1046_v28 }
 0x16b   : > { %v622_v1 = vpop.f32.mrf.mxu0 }
 0x16c   : > { %v623_v2 = vadd.f32 %v1155_v63, %v622_v1 }
 0x16e   : > { %v627_v3 = vsel %vm626_vm0, %v623_v2, -inf }
 0x16f   : > { %628 = vmax.xlane.f32.xlu0 %v627_v3 }
 0x173   : > { %v624_v4 = vpop.f32.mrf.mxu0 }
 0x1e2   : > { %v629_v8 = vpop.xlane.xlu0 %628 }
 0x1e3   : > { %v630_v9 = vsub.f32 %v623_v2, %v629_v8 }
 0x1e5   : > { %v631_v10 = vmul.f32 1.442695, %v630_v9 }
 0x1e7   : > { %1156 = vpow2.f32 %v631_v10 }
 0x1ed   : > { %v1157_v11 = vpop.eup %1156 }
 0x1ee   : > { %v633_v12 = vsel %vm626_vm0, %v1157_v11, 0.0 }
 0x1ef   : > { %634 = vadd.xlane.f32.xlu0 %v633_v12 }
 0x262   : > { %v635_v21 = vpop.xlane.xlu0 %634 }
 0x263   : > { %1158 = vrcp.f32 %v635_v21 }
 0x269   : > { %v1159_v22 = vpop.eup %1158 }
 0x26a   : > { %v637_v23 = vmul.f32 %v1159_v22, %v1157_v11 }
 0x26c   : > { %v638_v24 = vpack.c.bf16 %v637_v23, %v637_v23 }
 0x26e   : > { %987 = vmatmul.msk.bf16.vlgmr.msra.gmra.mxu3 %vm626_vm0, %v638_v24 }
 0x2f1   : > { %v655_v30 = vpop.f32.mrf.mxu3 }
 0x2f2   : > { %v660_v31 = vmul.f32 %v659_v29, %v655_v30 }
 0x2f4   : > { %v661_v32 = vrot.slane %v660_v31, 4 }
 0x2f6   : > { %v662_v33 = vadd.f32 %v661_v32, %v660_v31 }
 0x2f8   : > { %v663_v34 = vrot.slane %v662_v33, 2 }
 0x2f9   : > { %v657_v35 = vpop.f32.mrf.mxu3 }
 0x2fa   : > { %v664_v36 = vadd.f32 %v663_v34, %v662_v33 }
 0x2fc   : > { %v665_v37 = vrot.slane %v664_v36, 1 }
 0x2fe   : > { %v666_v38 = vadd.f32 %v665_v37, %v664_v36 }
 0x300   : > { %v667_v39 = vpack.c.bf16 %v666_v38, %v666_v38 }
 0x302   : > { %741 = vmatmul.bf16.vlgmr.msrb.gmra.mxu3 %v667_v39 }
 0x385   : > { %v742_v41 = vpop.f32.mrf.mxu3 }
 0x386   : > { %v743_v42 = vadd.f32 %v742_v41, %v684_v40 }
 0x388   : > { %746 = vst [vmem:[%s400_s14] sm:$0x1] %v743_v42 }
 0x389   : > { %1367 = shalt.err (!%p1364_p9)
}
 0x38a   : > { %1076 = dma.vmem_to_hbm [thread:$0]  (%p1560_p13), %s759_s11, 16, %s761_s23, %s748_s24  }
 0x38d   : > { %v744_v43 = vpop.f32.mrf.mxu3 }
 0x38e PF: > { %s772_s20 = sand.u32 1, %s1406_s27   ;;  %p1676_p10 = scmp.ge.s32.totalorder %s1418_s30, 2 }
 0x38f   : > { %s773_s19 = scalar_lea.sflag [#allocation4], %s772_s20 }
 0x390   : > { %p1099_p11 = pnand %p1676_p10, %p1565_p4 }
 0x392   : > { %p1100_p0 = pneg %p1099_p11 }
 0x394   : > { %1401 = dma.done.wait (%p1100_p0), %s773_s19, 16  }
 0x395   : > { %1403 = vsyncadd (%p1100_p0), %s773_s19, 4294967280  ;;  %p24_p2 = scmp.ge.s32.totalorder %s1540_s9, 4   ;;  %s1677_s27 = smov %s1410_s28 }
 0x396   : > { %s1678_s28 = smov %s1414_s29  ;;  %s1679_s29 = smov %s1552_s16 }
 0x397   : > { %s1680_s30 = smov %s1540_s9  ;;  %26 = sbr.rel (!%p24_p2) target bundleno = 11 (0xb), region = 117 }
 0x39c   :  { %778 = vsyncpa [#allocation3], 1 }
 0x39d   :  { %780 = vsyncpa [#allocation3 + $0x1], 1 }
 0x39e   :  { %781 = vsyncpa [#allocation6], 1 }
 0x39f   :  { %782 = vsyncpa [#allocation9], 1 }
 0x3a0   :  { %783 = vsyncpa [#allocation12], 1 }
 0x3a1   :  { %784 = vsyncpa [#allocation4], 1 }
 0x3a2   :  { %786 = vsyncpa [#allocation4 + $0x1], 1 }

</bundles_post_ra>
